<compile_context>
chip_gen: v6e
topology: v6e:2x2x1
jax: 0.10.0
libtpu: 0.0.40
codegen_flags: <defaults>
</compile_context>

<pallas_src>
import math

import jax
import jax.numpy as jnp
from jax.experimental import pallas as pl
from jax.experimental.pallas import tpu as pltpu


def _pool_project_kernel(x_ref, w_ref, o_ref):
    # x_ref: [tn, tk]  wire dtype (bf16/f32) -- flattened (spatial*channel) chunk
    # w_ref: [tk, 2]   wire dtype            -- matching chunk of the expanded weight
    # o_ref: [tn, 2]   f32                   -- partial logits, resident across k
    @pl.when(pl.program_id(2) == 0)
    def _():
        o_ref[...] = jnp.zeros_like(o_ref)

    # Single MXU matmul = spatial avg-pool + 1x1 conv fused, f32 accumulation.
    o_ref[...] += jnp.dot(x_ref[...], w_ref[...],
                          preferred_element_type=jnp.float32)


def _vmem_capacity_bytes():
    """Physical VMEM of the current TPU generation (trace-time query)."""
    try:
        info = pltpu.get_tpu_info()
        cap = int(getattr(info, "vmem_capacity_bytes", 0) or 0)
        if cap > 0:
            return cap
    except Exception:
        pass
    return 64 << 20  # conservative default: v7x per-TensorCore VMEM


def _choose_tk(k_total, itemsize, tn, blk_budget):
    """Reduction (HW*C) tile: a multiple of 128 (lane dim) dividing K, sized so
    the double-buffered [tn, tk] feature block stays inside the VMEM budget."""
    if k_total % 128 != 0:
        return k_total  # full-extent block is always a legal block shape
    max_tk = blk_budget // max(1, tn * itemsize)
    max_tk = max(128, (max_tk // 128) * 128)
    if k_total >= 4 * 128:
        # Prefer >= 4 reduction chunks: DMA/compute pipelining plus room for a
        # 2-way megacore split of the reduction at small batch.
        max_tk = min(max_tk, max(128, (k_total // 4 // 128) * 128))
    max_tk = min(max_tk, k_total)
    for cand in range(max_tk, 127, -128):
        if k_total % cand == 0:
            return cand
    return 128


def _pick_tiles(n, k_total, itemsize):
    cap = _vmem_capacity_bytes()
    budget = cap // 2        # leave half of physical VMEM as headroom
    blk_budget = budget // 4  # per-buffer feature block; x is double-buffered and
                              # shares the budget with the streamed weight chunk:
                              # v7x -> ~8 MiB blocks, v5e/v6e -> ~16 MiB blocks

    # Batch tile: second-minor dim of the (tn, tk) block must be %8 or == N.
    if n <= 8:
        tn = n
    else:
        tn = max(8, (((n + 1) // 2) // 8) * 8)   # >= 2 batch blocks (megacore)
        # never let a huge batch block starve the reduction tile below 128 lanes
        tn = min(tn, max(8, (blk_budget // (128 * itemsize) // 8) * 8))

    tk = _choose_tk(k_total, itemsize, tn, blk_budget)
    nk = k_total // tk if k_total % tk == 0 else 1
    ni = -(-n // tn)

    # If the batch axis has only one block, split the reduction 2-way across an
    # extra *parallel* grid axis so both v7x TensorCores get work.
    s = 2 if (ni == 1 and nk >= 2 and nk % 2 == 0) else 1
    return tn, tk, ni, nk // s, s


def binary_model_head(feats_nhwc, conv_weight, conv_bias):
    """Fused AdaptiveAvgPool2d(1) + 1x1-conv classifier head.

    feats_nhwc : [N, H, W, C] backbone features, channels-last, wire dtype
                 (bf16 or f32) -- no wrapper-side upcast or transpose.
    conv_weight: [2, C, 1, 1] (PyTorch Conv2d layout).  conv_bias: [2].
    Returns (logits, None), matching `self.classify(x).squeeze()` of the module.
    """
    n, h, w, c = feats_nhwc.shape
    hw = h * w
    k_total = hw * c
    dtype = feats_nhwc.dtype
    itemsize = jnp.dtype(dtype).itemsize

    # Contiguous flatten of spatial*channel (free, no HBM copy).
    x2 = feats_nhwc.reshape(n, k_total)

    # Expand the [C, 2] 1x1-conv weight to [HW*C, 2] in the wire dtype so pool +
    # projection become one lane-dense MXU contraction.  Extra HBM traffic is
    # <= 2/tn of the feature traffic.  The 1/HW scale is applied later in f32.
    w_mat = conv_weight.reshape(2, c).T.astype(dtype)                   # [C, 2]
    w_exp = jnp.broadcast_to(w_mat[None], (hw, c, 2)).reshape(k_total, 2)

    tn, tk, ni, nk, s = _pick_tiles(n, k_total, itemsize)
    grid = (s, ni, nk)

    cap = _vmem_capacity_bytes()
    vmem_limit = min((cap * 3) // 4, 96 << 20)

    cost = pl.CostEstimate(
        flops=4 * n * k_total,                               # fused pool + conv
        transcendentals=0,
        bytes_accessed=n * k_total * itemsize                # features
        + ni * k_total * 2 * itemsize                        # streamed weight
        + s * n * 2 * 4,                                     # partial logits
    )

    partials = pl.pallas_call(
        _pool_project_kernel,
        out_shape=jax.ShapeDtypeStruct((s, n, 2), jnp.float32),
        grid_spec=pltpu.PrefetchScalarGridSpec(
            num_scalar_prefetch=0,
            grid=grid,
            in_specs=[
                pl.BlockSpec((tn, tk), lambda si, i, ki: (i, si * nk + ki)),
                pl.BlockSpec((tk, 2), lambda si, i, ki: (si * nk + ki, 0)),
            ],
            # Leading dim squeezed: kernel sees a resident (tn, 2) f32 accumulator.
            out_specs=pl.BlockSpec((None, tn, 2), lambda si, i, ki: (si, i, 0)),
        ),
        compiler_params=pltpu.CompilerParams(
            dimension_semantics=("parallel", "parallel", "arbitrary"),
            vmem_limit_bytes=vmem_limit,
        ),
        cost_estimate=cost,
    )(x2, w_exp)

    # Tiny f32 epilogue on [S, N, 2]: combine reduction splits, fold the
    # avg-pool 1/HW, add the conv bias, squeeze like the PyTorch module.
    logits = partials.sum(axis=0) * jnp.float32(1.0 / hw)
    logits = logits + conv_bias.astype(jnp.float32)[None, :]
    return jnp.squeeze(logits), None


def init_classify_params(key, in_features):
    # Matches the module's init: weight ~ N(0, sqrt(2/n)) with
    # n = kh * kw * out_channels = 1 * 1 * 2, bias zeroed.
    out_channels = 2
    n = 1 * 1 * out_channels
    std = math.sqrt(2.0 / n)
    weight = std * jax.random.normal(key, (out_channels, in_features, 1, 1),
                                     dtype=jnp.float32)
    bias = jnp.zeros((out_channels,), dtype=jnp.float32)
    return weight, bias


if __name__ == "__main__":
    key = jax.random.PRNGKey(0)
    k_x, k_w = jax.random.split(key)

    # Small synthetic backbone feature map standing in for base(x) before the
    # avg-pool: batch=2, spatial 8x8, channels=32, NHWC, bf16 on the wire.
    N, H, W, C = 2, 8, 8, 32
    feats = jax.random.normal(k_x, (N, H, W, C),
                              dtype=jnp.float32).astype(jnp.bfloat16)
    conv_w, conv_b = init_classify_params(k_w, C)

    logits, unc = binary_model_head(feats, conv_w, conv_b)
    logits = jax.block_until_ready(logits)

    # Precision-matched reference: same bf16 features & bf16 weight, f32
    # accumulation, 1/HW applied in f32 (elementwise contraction -> no MXU
    # precision ambiguity in the reference itself).
    f32 = feats.astype(jnp.float32).reshape(N, H * W, C)
    pooled_sum = f32.sum(axis=1)                                   # [N, C] f32
    w_bf16 = conv_w.reshape(2, C).T.astype(jnp.bfloat16).astype(jnp.float32)
    ref = (pooled_sum[:, :, None] * w_bf16[None, :, :]).sum(axis=1)
    ref = ref * (1.0 / (H * W)) + conv_b

    # Module-semantics reference (full f32 weight) with bf16-appropriate tolerance.
    w_f32 = conv_w.reshape(2, C).T.astype(jnp.float32)
    ref_f32 = ((pooled_sum / (H * W))[:, :, None] * w_f32[None, :, :]).sum(axis=1)
    ref_f32 = ref_f32 + conv_b

    assert logits.shape == (N, 2)
    assert unc is None
    assert jnp.allclose(logits, ref, atol=1e-4, rtol=1e-4)
    assert jnp.allclose(logits, ref_f32, atol=5e-2, rtol=5e-2)

    print("KERNEL_OK")
</pallas_src>

<mosaic_0001>
module attributes {stable_mosaic.version = 11 : i64} {
  func.func @_pool_project_kernel(%arg0: i32, %arg1: i32, %arg2: i32, %arg3: memref<2x512xbf16, #tpu.memory_space<vmem>>, %arg4: memref<512x2xbf16, #tpu.memory_space<vmem>>, %arg5: memref<1x2x2xf32, #tpu.memory_space<vmem>>) attributes {dimension_semantics = [#tpu.dimension_semantics<parallel>, #tpu.dimension_semantics<parallel>, #tpu.dimension_semantics<arbitrary>], iteration_bounds = array<i64: 2, 1, 2>, scalar_prefetch = 0 : i64, scratch_operands = 0 : i64, tpu.core_type = #tpu.core_type<tc>, window_params = [{transform_indices = @transform_0, window_bounds = array<i64: 2, 512>}, {transform_indices = @transform_1, window_bounds = array<i64: 512, 2>}, {transform_indices = @transform_2, window_bounds = array<i64: 1, 2, 2>}]} {
    %c0_i32 = arith.constant 0 : i32
    %0 = arith.cmpi eq, %arg2, %c0_i32 : i32
    %1 = arith.extui %0 : i1 to i32
    %c0_i32_0 = arith.constant 0 : i32
    %2 = arith.cmpi ne, %1, %c0_i32_0 : i32
    scf.if %2 {
      %cst_10 = arith.constant 0.000000e+00 : f32
      %12 = vector.broadcast %cst_10 : f32 to vector<2x2xf32>
      %c0_11 = arith.constant 0 : index
      %c0_12 = arith.constant 0 : index
      %c0_13 = arith.constant 0 : index
      %13 = vector.load %arg5[%c0_11, %c0_12, %c0_13] : memref<1x2x2xf32, #tpu.memory_space<vmem>>, vector<1x2x2xf32>
      %14 = vector.shape_cast %13 : vector<1x2x2xf32> to vector<2x2xf32>
      %15 = vector.shape_cast %12 : vector<2x2xf32> to vector<1x2x2xf32>
      tpu.vector_store %arg5[%c0_11, %c0_12, %c0_13], %15 {strides = array<i32>} : memref<1x2x2xf32, #tpu.memory_space<vmem>>, vector<1x2x2xf32>,
    } else {
    }
    %c0 = arith.constant 0 : index
    %c0_1 = arith.constant 0 : index
    %c0_2 = arith.constant 0 : index
    %3 = vector.load %arg5[%c0, %c0_1, %c0_2] : memref<1x2x2xf32, #tpu.memory_space<vmem>>, vector<1x2x2xf32>
    %4 = vector.shape_cast %3 : vector<1x2x2xf32> to vector<2x2xf32>
    %c0_3 = arith.constant 0 : index
    %c0_4 = arith.constant 0 : index
    %5 = vector.load %arg3[%c0_3, %c0_4] : memref<2x512xbf16, #tpu.memory_space<vmem>>, vector<2x512xbf16>
    %c0_5 = arith.constant 0 : index
    %c0_6 = arith.constant 0 : index
    %6 = vector.load %arg4[%c0_5, %c0_6] : memref<512x2xbf16, #tpu.memory_space<vmem>>, vector<512x2xbf16>
    %cst = arith.constant dense<0.000000e+00> : vector<2x2xf32>
    %7 = tpu.matmul %5, %6, %cst {dimension_numbers = #tpu.dot_dimension_numbers<[1], [0], [0], [1], [0, 0, 1, 1], [], []>} : vector<2x512xbf16>, vector<512x2xbf16>, vector<2x2xf32> -> vector<2x2xf32>
    %8 = arith.addf %4, %7 : vector<2x2xf32>
    %c0_7 = arith.constant 0 : index
    %c0_8 = arith.constant 0 : index
    %c0_9 = arith.constant 0 : index
    %9 = vector.load %arg5[%c0_7, %c0_8, %c0_9] : memref<1x2x2xf32, #tpu.memory_space<vmem>>, vector<1x2x2xf32>
    %10 = vector.shape_cast %9 : vector<1x2x2xf32> to vector<2x2xf32>
    %11 = vector.shape_cast %8 : vector<2x2xf32> to vector<1x2x2xf32>
    tpu.vector_store %arg5[%c0_7, %c0_8, %c0_9], %11 {strides = array<i32>} : memref<1x2x2xf32, #tpu.memory_space<vmem>>, vector<1x2x2xf32>,
    return
  }
  func.func @transform_0(%arg0: i32, %arg1: i32, %arg2: i32) -> (i32, i32) {
    %c2_i32 = arith.constant 2 : i32
    %0 = arith.muli %arg0, %c2_i32 : i32
    %1 = arith.addi %0, %arg2 : i32
    %c0_i32 = arith.constant 0 : i32
    return %arg1, %1 : i32, i32
  }
  func.func @transform_1(%arg0: i32, %arg1: i32, %arg2: i32) -> (i32, i32) {
    %c2_i32 = arith.constant 2 : i32
    %0 = arith.muli %arg0, %c2_i32 : i32
    %1 = arith.addi %0, %arg2 : i32
    %c0_i32 = arith.constant 0 : i32
    %c0_i32_0 = arith.constant 0 : i32
    return %1, %c0_i32 : i32, i32
  }
  func.func @transform_2(%arg0: i32, %arg1: i32, %arg2: i32) -> (i32, i32, i32) {
    %c0_i32 = arith.constant 0 : i32
    %c0_i32_0 = arith.constant 0 : i32
    return %arg0, %arg1, %c0_i32 : i32, i32, i32
  }
}

</mosaic_0001>

<bundles_post_ra>
// kernel: tpu_custom_call.1
= control target key start
LH: loop header
LB: loop body
LE: loop exit
PB: predicated region body
PF: predicated region fallthrough
CT: control target
= control target key end

     0   :  { %7 = vsyncpa [#allocation3], 0  ;;  %s1196_s0 = inlined_call_operand.vmem [shape: bf16[2,2048], index: 0, kind: input, shape index: {}]   ;;  %s1197_s1 = inlined_call_operand.vmem [shape: bf16[2048,2], index: 1, kind: input, shape index: {}]   ;;  %s1198_s2 = inlined_call_operand.hbm [shape: f32[2,2,2], index: 2, kind: output, shape index: {}]  }
   0x1   :  { %9 = vsyncpa [#allocation3 + $0x1], 0  ;;  %s1021_s9 = smov 0   ;;  %s1023_s10 = smov 0  }
   0x2   :  { %s1025_s11 = smov 0   ;;  %s1027_s12 = smov 0  }
   0x3   :  { %s1029_s13 = smov 0   ;;  %s1031_s14 = smov 0  }
   0x4   :  { %s1033_s15 = smov 0   ;;  %s1035_s16 = smov 0  }
   0x5 LB: > { %s707_s17 = sadd.s32 4294967295, %s1001_s16   ;;  %s708_s18 = sadd.s32 4294967294, %s1001_s16   ;;  %s1001_s16 = sphi %s1035_s16, %s15_s16   ;;  %s997_s15 = sphi %s1033_s15, %s1207_s15   ;;  %s993_s14 = sphi %s1031_s14, %s1206_s14   ;;  %s989_s13 = sphi %s1029_s13, %s1205_s13   ;;  %s985_s12 = sphi %s1027_s12, %s1204_s12   ;;  %s981_s11 = sphi %s1025_s11, %s1203_s11   ;;  %s977_s10 = sphi %s1023_s10, %s1202_s10   ;;  %s973_s9 = sphi %s1021_s9, %s1201_s9  }
   0x6   : > { %s27_s19 = sadd.s32 1, %s993_s14  ;;  %s34_s20 = sadd.s32 1, %s997_s15 }
   0x7   : > { %p28_p0 = scmp.ge.s32.totalorder %s27_s19, 2  ;;  %p115_p1 = scmp.ne.s32.totalorder %s981_s11, %s977_s10 }
   0x8   : > { %p116_p2 = scmp.eq.s32.totalorder %s707_s17, 3  ;;  %p121_p4 = scmp.ne.s32.totalorder %s977_s10, %s973_s9 }
   0x9   : > { %s1209_s19 = smov (%p28_p0, %s27_s19), 0  ;;  %s1211_s20 = smov (!%p28_p0, %s34_s20), %s997_s15 }
   0xa   : > { %p1070_p3 = por %p116_p2, %p115_p1  ;;  %p36_p5 = scmp.ge.s32.totalorder %s1211_s20, 2 }
   0xb   : > { %p122_p6 = scmp.eq.s32.totalorder %s708_s18, 3  ;;  %p715_p7 = scmp.ge.s32.totalorder %s1001_s16, 1 }
   0xc   : > { %p169_p8 = scmp.lt.s32.totalorder %s1001_s16, 5  ;;  %s1213_s20 = smov (%p36_p5, %s1211_s20), 0 }
   0xd   : > { %p1080_p9 = por %p122_p6, %p121_p4  ;;  %s100_s23 = ssub.s32 %s997_s15, %s1213_s20 }
   0xe   : > { %p170_p10 = pnand %p715_p7, %p169_p8  ;;  %s105_s24 = sadd.s32 1, %s981_s11 }
   0xf   : > { %p103_p11 = scmp.eq.s32.totalorder %s100_s23, 0  ;;  %s200_s26 = sand.u32 (!%p170_p10), 1, %s977_s10  }
  0x10   : > { %173 = sbr.rel (%p170_p10) target bundleno = 280 (0x118), region = 28  ;;  %s717_s27 = sshll.u32 (!%p170_p10), %s989_s13, 1 }
  0x11   : > { %s1088_s25 = scalar_select %p103_p11, %s981_s11, %s105_s24  }
  0x12   : > { %s716_s28 = sshll.u32 (!%p170_p10), %s200_s26, 1  ;;  %s204_s29 = sadd.s32 (!%p170_p10), %s985_s12, %s717_s27 }
  0x13   : > { %s718_s30 = sshll.u32 (!%p170_p10), %s204_s29, 2  ;;  %s720_s3 = sshll.u32 (!%p170_p10), %s204_s29, 6 }
  0x14   : > { %p208_p12 = scmp.lt.s32.totalorder (!%p170_p10), %s718_s30, 15  ;;  %p219_p13 = scmp.lt.s32.totalorder (!%p170_p10), %s720_s3, 255 }
  0x15   : > { %s1106_s23 = scalar_lea.vmem [#allocation2], %s716_s28  ;;  %p722_p0 = scmp.ne.s32.totalorder %s985_s12, 0 }
  0x16   : > { %s1215_s30 = smov (!%p208_p12, %s718_s30), 15  ;;  %s1217_s3 = smov (!%p219_p13, %s720_s3), 255 }
  0x17   : > { %s212_s6 = scalar_lea.vmem %s1196_s0, %s1215_s30  ;;  %s721_s7 = sshll.u32 %s1217_s3, 2 }
  0x18   : > { %s1104_s18 = scalar_lea.vmem %s1197_s1, %s721_s7  ;;  %230 = sbr.rel (%p722_p0) target bundleno = 31 (0x1f), region = 32 }
  0x1d   : > { %vm231_vm0 = vcmask 9216   ;;  %v1003_v0 = vmov 0.0  }
  0x1e   : > { %232 = vst.msk [vmem:[%s1106_s23] sm:$0x3] %vm231_vm0, %v1003_v0 }
  0x1f PF: > { %v877_v1 = vld [vmem:[%s1104_s18 + $0x78] sm:$0xff]   ;;  %v881_v5 = vld [vmem:[%s1104_s18 + $0x70] sm:$0xff]   ;;  %v885_v9 = vld [vmem:[%s1104_s18 + $0x68] sm:$0xff]   ;;  %v311_v31 = vlaneseq  ;;  %v1004_v35 = vmov 1966171168   ;;  %s757_s27 = sshll.u32 %s989_s13, 5 }
  0x20   : > { %v878_v2 = vld [vmem:[%s1104_s18 + $0xf8] sm:$0xff]   ;;  %760 = vmatprep.subr.bf16.mxu0 %v877_v1  ;;  %v882_v6 = vld [vmem:[%s1104_s18 + $0xf0] sm:$0xff]   ;;  %v886_v10 = vld [vmem:[%s1104_s18 + $0xe8] sm:$0xff]   ;;  %v309_v36 = vunpack.c.l.s4 %v1004_v35  ;;  %s618_s28 = sshll.u32 %s1106_s23, 4  ;;  %vm601_vm1 = vcmask 9216   ;;  %s616_s3 = scalar_lea.hbm %s1198_s2, %s757_s27  ;;  %s619_s28 = int_to_ptr.vmem [resolvable:$true] %s618_s28 }
  0x21   : > { %v879_v3 = vld [vmem:[%s1104_s18 + $0x38] sm:$0xff]   ;;  %782 = vmatprep.subr.bf16.mxu1 %v878_v2  ;;  %v883_v7 = vld [vmem:[%s1104_s18 + $0x30] sm:$0xff]   ;;  %v887_v11 = vld [vmem:[%s1104_s18 + $0x28] sm:$0xff]   ;;  %v312_v37 = vshrl.u32 %v311_v31, 7  ;;  %s604_s4 = scalar_lea.sflag [#allocation3], %s200_s26  ;;  %s909_s5 = scalar_lea.vmem %s619_s28, 32 }
  0x22   : > { %v880_v4 = vld [vmem:[%s1104_s18 + $0xb8] sm:$0xff]   ;;  %761 = vmatpush3.bf16.msra.mxu0 %v879_v3  ;;  %v884_v8 = vld [vmem:[%s1104_s18 + $0xb0] sm:$0xff]   ;;  %v888_v12 = vld [vmem:[%s1104_s18 + $0xa8] sm:$0xff]   ;;  %v310_v39 = vunpack.c.0.s8 %v309_v36  ;;  %p910_p1 = scmp.ne.s32.totalorder %s619_s28, %s909_s5 }
  0x23   : > { %783 = vmatpush3.bf16.msra.mxu1 %v880_v4  ;;  %762 = vmatprep.subr.bf16.mxu0 %v881_v5  ;;  %v889_v13 = vld [vmem:[%s1104_s18 + $0x60] sm:$0xff]   ;;  %v893_v17 = vld [vmem:[%s1104_s18 + $0x58] sm:$0xff]   ;;  %v897_v21 = vld [vmem:[%s1104_s18 + $0x50] sm:$0xff]  }
  0x24   : > { %784 = vmatprep.subr.bf16.mxu1 %v882_v6  ;;  %v890_v14 = vld [vmem:[%s1104_s18 + $0xe0] sm:$0xff]   ;;  %v894_v18 = vld [vmem:[%s1104_s18 + $0xd8] sm:$0xff]   ;;  %v898_v22 = vld [vmem:[%s1104_s18 + $0xd0] sm:$0xff]   ;;  %v313_v40 = vsub.s32 %v310_v39, %v312_v37  ;;  %p911_p2 = pnand %p910_p1, %p1070_p3 }
  0x25   : > { %v891_v15 = vld [vmem:[%s1104_s18 + $0x20] sm:$0xff]   ;;  %v895_v19 = vld [vmem:[%s1104_s18 + $0x18] sm:$0xff]   ;;  %v899_v23 = vld [vmem:[%s1104_s18 + $0x10] sm:$0xff]  }
  0x26   : > { %763 = vmatpush3.bf16.msra.mxu0 %v883_v7  ;;  %v892_v16 = vld [vmem:[%s1104_s18 + $0xa0] sm:$0xff]   ;;  %v896_v20 = vld [vmem:[%s1104_s18 + $0x98] sm:$0xff]   ;;  %v900_v24 = vld [vmem:[%s1104_s18 + $0x90] sm:$0xff]   ;;  %p912_p4 = pneg %p911_p2 }
  0x27   : > { %785 = vmatpush3.bf16.msra.mxu1 %v884_v8  ;;  %764 = vmatprep.subr.bf16.mxu0 %v885_v9  ;;  %v901_v25 = vld [vmem:[%s1104_s18 + $0x48] sm:$0xff]   ;;  %v905_v29 = vld [vmem:[%s1104_s18 + $0x40] sm:$0xff]  }
  0x28   : > { %786 = vmatprep.subr.bf16.mxu1 %v886_v10  ;;  %v902_v26 = vld [vmem:[%s1104_s18 + $0xc8] sm:$0xff]   ;;  %v906_v30 = vld [vmem:[%s1104_s18 + $0xc0] sm:$0xff]  }
  0x29   : > { %v903_v27 = vld [vmem:[%s1104_s18 + $0x8] sm:$0xff]   ;;  %v907_v32 = vld [vmem:[%s1104_s18] sm:$0xff]  }
  0x2a   : > { %765 = vmatpush3.bf16.msra.mxu0 %v887_v11  ;;  %v904_v28 = vld [vmem:[%s1104_s18 + $0x88] sm:$0xff]   ;;  %v908_v33 = vld [vmem:[%s1104_s18 + $0x80] sm:$0xff]  }
  0x2b   : > { %787 = vmatpush3.bf16.msra.mxu1 %v888_v12  ;;  %766 = vmatprep.subr.bf16.mxu0 %v889_v13  ;;  %v723_v34 = vld.sshfl [vmem:[%s212_s6] sm:$0x33 pattern:$0x75316420]  ;;  %s1005_s6 = smov [#allocation2]  }
  0x2c   : > { %788 = vmatprep.subr.bf16.mxu1 %v890_v14  ;;  %v307_v38 = vcombine.high %v723_v34, %v723_v34  ;;  %v314_v42 = vrot.slane %v723_v34, %v313_v40  ;;  %v233_v52 = vld [vmem:[%s1106_s23] sm:$0x3]  ;;  %s913_s13 = sshll.u32 %s1005_s6, 4  ;;  %s914_s13 = int_to_ptr.vmem [resolvable:$false] %s913_s13 }
  0x2d   : > { %s915_s7 = scalar_lea.vmem %s914_s13, 64  ;;  %p916_p5 = scmp.lt.s32.totalorder %s619_s28, %s914_s13 }
  0x2e   : > { %767 = vmatpush3.bf16.msra.mxu0 %v891_v15  ;;  %v321_v41 = vrot.slane %v307_v38, %v313_v40  ;;  %v322_v44 = vcombine.high %v314_v42, %v314_v42  ;;  %p917_p6 = scmp.lt.s32.totalorder %s915_s7, %s909_s5 }
  0x2f   : > { %789 = vmatpush3.bf16.msra.mxu1 %v892_v16  ;;  %768 = vmatprep.subr.bf16.mxu0 %v893_v17 }
  0x30   : > { %790 = vmatprep.subr.bf16.mxu1 %v894_v18  ;;  %552 = vmatprep.mubr.bf16.mxu0 %v321_v41  ;;  %v323_v43 = vcombine.high %v321_v41, %v321_v41  ;;  %p918_p7 = por %p917_p6, %p916_p5 }
  0x32   : > { %769 = vmatpush3.bf16.msra.mxu0 %v895_v19  ;;  %592 = vmatprep.mubr.bf16.mxu1 %v323_v43  ;;  %p919_p8 = pnand %p918_p7, %p912_p4 }
  0x33   : > { %791 = vmatpush3.bf16.msra.mxu1 %v896_v20  ;;  %770 = vmatprep.subr.bf16.mxu0 %v897_v21 }
  0x34   : > { %792 = vmatprep.subr.bf16.mxu1 %v898_v22 }
  0x36   : > { %771 = vmatpush3.bf16.msra.mxu0 %v899_v23 }
  0x37   : > { %793 = vmatpush3.bf16.msra.mxu1 %v900_v24  ;;  %772 = vmatprep.subr.bf16.mxu0 %v901_v25 }
  0x38   : > { %794 = vmatprep.subr.bf16.mxu1 %v902_v26 }
  0x3a   : > { %773 = vmatpush3.bf16.msra.mxu0 %v903_v27 }
  0x3b   : > { %795 = vmatpush3.bf16.msra.mxu1 %v904_v28  ;;  %774 = vmatprep.subr.bf16.mxu0 %v905_v29 }
  0x3c   : > { %796 = vmatprep.subr.bf16.mxu1 %v906_v30 }
  0x3e   : > { %775 = vmatpush3.bf16.msra.mxu0 %v907_v32 }
  0x3f   : > { %797 = vmatpush3.bf16.msra.mxu1 %v908_v33 }
  0x41   : > { %553 = vmatmul.mubr.bf16.vlgmr.msra.gmra.mxu0 %v314_v42 }
  0x42   : > { %593 = vmatmul.mubr.bf16.vlgmr.msra.gmra.mxu1 %v322_v44 }
 0x101   : > { %v776_v45 = vpop.f32.mrf.mxu0 }
 0x102   : > { %v798_v46 = vpop.f32.mrf.mxu1 }
 0x103   : > { %v777_v47 = vpop.f32.mrf.mxu0 }
 0x104   : > { %v778_v48 = vadd.f32 %v777_v47, %v776_v45  ;;  %v799_v49 = vpop.f32.mrf.mxu1 }
 0x105   : > { %v779_v50 = vpop.f32.mrf.mxu0  ;;  %v800_v51 = vadd.f32 %v799_v49, %v798_v46 }
 0x106   : > { %v801_v53 = vpop.f32.mrf.mxu1 }
 0x107   : > { %v780_v54 = vpop.f32.mrf.mxu0  ;;  %v595_v55 = vadd.f32 %v800_v51, %v778_v48 }
 0x108   : > { %v802_v56 = vpop.f32.mrf.mxu1 }
 0x109   : > { %v600_v57 = vadd.f32 %v595_v55, %v233_v52 }
 0x10b   : > { %602 = vst.msk [vmem:[%s1106_s23] sm:$0x3] %vm601_vm1, %v600_v57 }
 0x10c   : > { %922 = shalt.err (!%p919_p8)
}
 0x10d   : > { %s923_s8 = scalar_lea.hbm %s616_s3, 32  ;;  %s927_s18 = scalar_lea.hbm %s1198_s2, 64 }
 0x10e   : > { %p924_p10 = scmp.ne.s32.totalorder %s616_s3, %s923_s8  ;;  %p928_p13 = scmp.lt.s32.totalorder %s616_s3, %s1198_s2 }
 0x10f   : > { %p929_p0 = scmp.lt.s32.totalorder %s927_s18, %s923_s8 }
 0x110   : > { %p925_p11 = pnand %p924_p10, %p1070_p3 }
 0x111   : > { %p930_p1 = por %p929_p0, %p928_p13 }
 0x112   : > { %p926_p12 = pneg %p925_p11 }
 0x114   : > { %p931_p2 = pnand %p930_p1, %p926_p12 }
 0x116   : > { %934 = shalt.err (!%p931_p2)
}
 0x117   : > { %804 = dma.vmem_to_hbm [thread:$0]  (%p1070_p3), %s619_s28, 32, %s616_s3, %s604_s4  }
 0x118 PF: > { %p810_p4 = scmp.ge.s32.totalorder %s1001_s16, 2  ;;  %s630_s24 = sand.u32 1, %s973_s9  }
 0x119   : > { %s631_s27 = scalar_lea.sflag [#allocation3], %s630_s24 }
 0x11a   : > { %p807_p5 = pnand %p810_p4, %p1080_p9 }
 0x11c   : > { %p808_p6 = pneg %p807_p5 }
 0x11e   : > { %968 = dma.done.wait (%p808_p6), %s631_s27, 32  }
 0x11f   : > { %970 = vsyncadd (%p808_p6), %s631_s27, 4294967264  ;;  %s15_s16 = sadd.s32 1, %s1001_s16   ;;  %s1201_s9 = smov %s977_s10 }
 0x120   : > { %p12_p7 = scmp.ge.s32.totalorder %s15_s16, 6   ;;  %s1202_s10 = smov %s981_s11 }
 0x121   : > { %s1203_s11 = smov %s1088_s25  ;;  %s1204_s12 = smov %s993_s14 }
 0x122   : > { %s1205_s13 = smov %s997_s15  ;;  %s1206_s14 = smov %s1209_s19 }
 0x123   : > { %s1207_s15 = smov %s1213_s20  ;;  %14 = sbr.rel (!%p12_p7) target bundleno = 5 (0x5), region = 70 }
 0x128   :  { %636 = vsyncpa [#allocation3], 1 }
 0x129   :  { %638 = vsyncpa [#allocation3 + $0x1], 1 }

</bundles_post_ra>
